<compile_context>
chip_gen: v6e
topology: v6e:2x2x1
jax: 0.10.0
libtpu: 0.0.40
codegen_flags: <defaults>
</compile_context>

<pallas_src>
import functools

import jax
import jax.numpy as jnp
from jax import lax
from jax.experimental import pallas as pl
from jax.experimental.pallas import tpu as pltpu

_LANE = 128


def _trig_act_kernel(x_ref, o_ref, *, compute_dtype):
    # x_ref / o_ref: (bb, C, tile) VMEM block (last block may be ragged; OOB
    # lanes hold unspecified data and their writes are masked by Pallas).
    t = jnp.tanh(x_ref[...].astype(compute_dtype))           # EUP tanh
    tf = t.astype(jnp.float32)
    sq = jnp.sum(tf * tf, axis=1, keepdims=True)              # (bb, 1, tile) per-lane-column reduce
    # norm == 0 -> divide by 1.  rsqrt(0)=inf is computed but discarded by the select.
    inv = jnp.where(sq > 0.0, lax.rsqrt(sq), 1.0)
    o_ref[...] = (t * inv.astype(compute_dtype)).astype(o_ref.dtype)


def _round_up(x, m):
    return (x + m - 1) // m * m


def _vmem_capacity_bytes():
    try:
        return int(pltpu.get_tpu_info().vmem_capacity_bytes)
    except Exception:
        return 64 * 1024 * 1024  # conservative fallback (v7x per-TensorCore)


def _native_bf16_compute_ok():
    # bf16 VPU/EUP exists on v6e / v7x; v5e and older must compute in f32.
    try:
        kind = jax.devices()[0].device_kind.lower()
    except Exception:
        return False
    return any(tag in kind for tag in ("v6", "v7", "7x"))


def trigonometric_activation(x):
    """x: [B, C, *spatial] -> same shape; tanh then L2-normalize over dim 1."""
    B, C = x.shape[0], x.shape[1]
    S = 1
    for d in x.shape[2:]:
        S *= int(d)
    x_flat = x.reshape(B, C, S)

    itemsize = jnp.dtype(x.dtype).itemsize
    compute_dtype = (
        jnp.bfloat16
        if (x.dtype == jnp.bfloat16 and _native_bf16_compute_ok())
        else jnp.float32
    )

    # ---- VMEM budget per 128-lane column of one block (bb = 1) --------------
    # in/out blocks are sublane-padded per dtype packing and double-buffered by
    # the pipeline; conservatively count two block-shaped f32 temporaries for
    # the tanh / normalization intermediates.
    sublanes = max(8, 32 // itemsize)                 # 8 (f32) / 16 (bf16) / 32 (i8)
    c_pad_io = _round_up(C, sublanes)
    c_pad_f32 = _round_up(C, 8)
    per_col_bytes = _LANE * (2 * 2 * c_pad_io * itemsize + 2 * c_pad_f32 * 4)

    capacity = _vmem_capacity_bytes()
    vmem_limit = min(capacity // 2, 64 * 1024 * 1024)  # 32 MiB on v7x, 64 MiB on v5e/v6e
    vmem_limit = max(vmem_limit, min(capacity, 2 * per_col_bytes))
    budget = int(0.8 * vmem_limit)

    # ---- spatial tile selection (cdiv grid, no divisor search) --------------
    S_cols = pl.cdiv(S, _LANE)
    cols_in_budget = max(1, budget // per_col_bytes)
    tile_cols = min(S_cols, cols_in_budget)

    # Keep both v7x TensorCores busy: aim for >= 8 grid steps when the spatial
    # extent allows it, but never drop below ~512-lane tiles (roofline cliff).
    if B * pl.cdiv(S_cols, tile_cols) < 8 and S_cols > 1:
        want_tiles = min(S_cols, pl.cdiv(8, B))
        tile_cols = min(tile_cols, max(min(4, S_cols), pl.cdiv(S_cols, want_tiles)))

    tile = tile_cols * _LANE
    if tile >= S:
        tile = S              # full extent: satisfies the (8,128) rule exactly
        n_tiles = 1
    else:
        n_tiles = pl.cdiv(S, tile)

    # ---- batch blocking for tiny spatial extents -----------------------------
    bb = 1
    step_io_bytes = 2 * C * tile * itemsize
    if n_tiles == 1 and B > 1 and step_io_bytes < (1 << 20):
        bb_budget = max(1, cols_in_budget // max(1, S_cols))
        bb_target = pl.cdiv(1 << 20, max(1, step_io_bytes))
        bb = max(1, min(B, bb_budget, bb_target))
        # keep >= min(B, 8) grid steps so megacore sharding still has work
        bb = min(bb, max(1, B // min(B, 8)))

    grid = (pl.cdiv(B, bb), n_tiles)
    block = (bb, C, tile)

    kernel = functools.partial(_trig_act_kernel, compute_dtype=compute_dtype)

    out = pl.pallas_call(
        kernel,
        out_shape=jax.ShapeDtypeStruct((B, C, S), x.dtype),
        grid_spec=pl.GridSpec(
            grid=grid,
            in_specs=[pl.BlockSpec(block, lambda b, s: (b, 0, s))],
            out_specs=pl.BlockSpec(block, lambda b, s: (b, 0, s)),
        ),
        compiler_params=pltpu.CompilerParams(
            dimension_semantics=("parallel", "parallel"),
            vmem_limit_bytes=vmem_limit,
        ),
        cost_estimate=pl.CostEstimate(
            flops=5 * B * C * S,
            transcendentals=B * C * S + B * S,                    # tanh + rsqrt
            bytes_accessed=2 * grid[0] * bb * C * n_tiles * tile * itemsize,
        ),
    )(x_flat)

    return out.reshape(x.shape)


def _reference(x):
    t = jnp.tanh(x)
    norm = jnp.sqrt(jnp.sum(t * t, axis=1, keepdims=True))
    norm = jnp.where(norm == 0.0, 1.0, norm)
    return t / norm


if __name__ == "__main__":
    key = jax.random.PRNGKey(0)
    # Module has no parameters; any [B, C, H, W] input works.
    x = jax.random.normal(key, (2, 4, 16, 16), dtype=jnp.float32)

    out = jax.block_until_ready(trigonometric_activation(x))
    ref = _reference(x)

    assert out.shape == x.shape
    assert jnp.allclose(out, ref, atol=1e-5, rtol=1e-5), "mismatch vs reference"

    print("KERNEL_OK")
</pallas_src>

<mosaic_0001>
module attributes {stable_mosaic.version = 11 : i64} {
  func.func @_trig_act_kernel(%arg0: i32, %arg1: i32, %arg2: memref<1x4x256xf32, #tpu.memory_space<vmem>>, %arg3: memref<1x4x256xf32, #tpu.memory_space<vmem>>) attributes {dimension_semantics = [#tpu.dimension_semantics<parallel>, #tpu.dimension_semantics<parallel>], iteration_bounds = array<i64: 2, 1>, scalar_prefetch = 0 : i64, scratch_operands = 0 : i64, tpu.core_type = #tpu.core_type<tc>, window_params = [{transform_indices = @transform_0, window_bounds = array<i64: 1, 4, 256>}, {transform_indices = @transform_1, window_bounds = array<i64: 1, 4, 256>}]} {
    %c0 = arith.constant 0 : index
    %c0_0 = arith.constant 0 : index
    %c0_1 = arith.constant 0 : index
    %0 = vector.load %arg2[%c0, %c0_0, %c0_1] : memref<1x4x256xf32, #tpu.memory_space<vmem>>, vector<1x4x256xf32>
    %1 = math.tanh %0 : vector<1x4x256xf32>
    %2 = arith.mulf %1, %1 : vector<1x4x256xf32>
    %cst = arith.constant dense<0.000000e+00> : vector<1x256xf32>
    %3 = vector.multi_reduction <add>, %2, %cst [1] : vector<1x4x256xf32> to vector<1x256xf32>
    %4 = vector.shape_cast %3 : vector<1x256xf32> to vector<1x1x256xf32>
    %cst_2 = arith.constant 0.000000e+00 : f32
    %5 = vector.broadcast %cst_2 : f32 to vector<1x1x256xf32>
    %6 = arith.cmpf ogt, %4, %5 : vector<1x1x256xf32>
    %7 = math.rsqrt %4 : vector<1x1x256xf32>
    %cst_3 = arith.constant 1.000000e+00 : f32
    %8 = vector.broadcast %cst_3 : f32 to vector<1x1x256xf32>
    %9 = arith.select %6, %7, %8 : vector<1x1x256xi1>, vector<1x1x256xf32>
    %10 = vector.broadcast %9 : vector<1x1x256xf32> to vector<1x4x256xf32>
    %11 = arith.mulf %1, %10 : vector<1x4x256xf32>
    %c0_4 = arith.constant 0 : index
    %c0_5 = arith.constant 0 : index
    %c0_6 = arith.constant 0 : index
    %12 = vector.load %arg3[%c0_4, %c0_5, %c0_6] : memref<1x4x256xf32, #tpu.memory_space<vmem>>, vector<1x4x256xf32>
    tpu.vector_store %arg3[%c0_4, %c0_5, %c0_6], %11 {strides = array<i32>} : memref<1x4x256xf32, #tpu.memory_space<vmem>>, vector<1x4x256xf32>,
    return
  }
  func.func @transform_0(%arg0: i32, %arg1: i32) -> (i32, i32, i32) {
    %c0_i32 = arith.constant 0 : i32
    %c0_i32_0 = arith.constant 0 : i32
    return %arg0, %c0_i32, %arg1 : i32, i32, i32
  }
  func.func @transform_1(%arg0: i32, %arg1: i32) -> (i32, i32, i32) {
    %c0_i32 = arith.constant 0 : i32
    %c0_i32_0 = arith.constant 0 : i32
    return %arg0, %c0_i32, %arg1 : i32, i32, i32
  }
}

</mosaic_0001>

<bundles_post_ra>
// kernel: tpu_custom_call.1
= control target key start
LH: loop header
LB: loop body
LE: loop exit
PB: predicated region body
PF: predicated region fallthrough
CT: control target
= control target key end

     0   :  { %6 = vsyncpa [#allocation3], 0  ;;  %s632_s0 = inlined_call_operand.hbm [shape: f32[2,4,256], index: 0, kind: input, shape index: {}]   ;;  %s633_s1 = inlined_call_operand.hbm [shape: f32[2,4,256], index: 1, kind: output, shape index: {}]  }
   0x1   :  { %8 = vsyncpa [#allocation3 + $0x1], 0 }
   0x2   :  { %9 = vsyncpa [#allocation4], 0 }
   0x3   :  { %11 = vsyncpa [#allocation4 + $0x1], 0  ;;  %s494_s6 = smov 0   ;;  %s496_s7 = smov 0  }
   0x4   :  { %s498_s8 = smov 0   ;;  %s500_s9 = smov 0  }
   0x5   :  { %s502_s10 = smov 0   ;;  %s504_s11 = smov 0  }
   0x6 LB: > { %s287_s12 = sadd.s32 4294967295, %s480_s11   ;;  %s288_s13 = sadd.s32 4294967294, %s480_s11   ;;  %s480_s11 = sphi %s504_s11, %s17_s11   ;;  %s476_s10 = sphi %s502_s10, %s645_s10   ;;  %s472_s9 = sphi %s500_s9, %s644_s9   ;;  %s468_s8 = sphi %s498_s8, %s643_s8   ;;  %s464_s7 = sphi %s496_s7, %s642_s7   ;;  %s460_s6 = sphi %s494_s6, %s641_s6  }
   0x7   : > { %s29_s14 = sadd.s32 1, %s476_s10  ;;  %s38_s15 = sadd.s32 1, %s468_s8 }
   0x8   : > { %p31_p0 = scmp.ge.s32.totalorder %s29_s14, 2  ;;  %p45_p1 = scmp.ne.s32.totalorder %s468_s8, %s464_s7 }
   0x9   : > { %p46_p2 = scmp.eq.s32.totalorder %s480_s11, 0  ;;  %p51_p3 = scmp.ne.s32.totalorder %s464_s7, %s460_s6 }
   0xa   : > { %s647_s14 = smov (%p31_p0, %s29_s14), 0  ;;  %p52_p5 = scmp.eq.s32.totalorder %s287_s12, 0 }
   0xb   : > { %p535_p4 = por %p46_p2, %p45_p1  ;;  %s33_s17 = ssub.s32 %s476_s10, %s647_s14 }
   0xc   : > { %p77_p6 = scmp.eq.s32.totalorder %s287_s12, 1  ;;  %p36_p7 = scmp.eq.s32.totalorder %s33_s17, 0 }
   0xd   : > { %p541_p8 = por %p52_p5, %p51_p3  ;;  %p83_p10 = scmp.eq.s32.totalorder %s288_s13, 1 }
   0xe   : > { %p545_p9 = por %p77_p6, %p45_p1  ;;  %p316_p13 = scmp.lt.s32.totalorder %s480_s11, 2 }
   0xf   : > { %s550_s20 = scalar_select %p36_p7, %s468_s8, %s38_s15  }
  0x10   : > { %p552_p11 = por %p83_p10, %p51_p3  ;;  %s103_s22 = sand.u32 1, %s468_s8  }
  0x11   : > { %s291_s23 = sshll.u32 %s103_s22, 3  ;;  %s302_s24 = sshll.u32 %s476_s10, 7 }
  0x12   : > { %s637_s21 = scalar_select %p552_p11, 1, 0 }
  0x13   : > { %s115_s27 = scalar_lea.hbm %s632_s0, %s302_s24  ;;  %s107_s28 = scalar_lea.vmem [#allocation2], %s291_s23 }
  0x14   : > { %s117_s29 = sshll.u32 %s107_s28, 4  ;;  %p565_p0 = pnand %p316_p13, %p535_p4  ;;  %s118_s29 = int_to_ptr.vmem [resolvable:$true] %s117_s29 }
  0x15   : > { %p294_p1 = scmp.ge.s32.totalorder %s480_s11, 1  ;;  %p122_p2 = scmp.lt.s32.totalorder %s480_s11, 3 }
  0x16   : > { %s104_s2 = scalar_lea.sflag [#allocation3], %s103_s22  ;;  %p374_p3 = pneg %p565_p0 }
  0x17   : > { %s385_s3 = scalar_lea.vmem %s118_s29, 128  ;;  %s482_s4 = smov [#allocation2]  }
  0x18   : > { %p386_p5 = scmp.ne.s32.totalorder %s118_s29, %s385_s3  ;;  %s390_s5 = sshll.u32 %s482_s4, 4  ;;  %s391_s5 = int_to_ptr.vmem [resolvable:$false] %s390_s5 }
  0x19   : > { %s392_s12 = scalar_lea.vmem %s391_s5, 256  ;;  %p393_p10 = scmp.lt.s32.totalorder %s118_s29, %s391_s5 }
  0x1a   : > { %p388_p6 = pnand %p386_p5, %p374_p3  ;;  %p394_p12 = scmp.lt.s32.totalorder %s392_s12, %s385_s3 }
  0x1c   : > { %p389_p7 = pneg %p388_p6  ;;  %p395_p4 = por %p394_p12, %p393_p10 }
  0x1e   : > { %p396_p13 = pnand %p395_p4, %p389_p7 }
  0x20   : > { %399 = shalt.err (!%p396_p13)
}
  0x21   : > { %311 = dma.hbm_to_vmem [thread:$0]  (!%p565_p0), %s115_s27, 128, %s118_s29, %s104_s2  }
  0x22   : > { %p123_p11 = pnand %p294_p1, %p122_p2 }
  0x23   : > { %s580_s13 = sand.u32 (!%p123_p11), 1, %s464_s7  }
  0x24   : > { %126 = sbr.rel (%p123_p11) target bundleno = 106 (0x6a), region = 24  ;;  %s295_s15 = sshll.u32 (!%p123_p11), %s580_s13, 3 }
  0x25   : > { %s129_s16 = scalar_lea.sflag (!%p123_p11), [#allocation3], %s580_s13  ;;  %s132_s17 = scalar_lea.vmem (!%p123_p11), [#allocation2], %s295_s15 }
  0x29   : > { %451 = dma.done.wait (%p541_p8), %s129_s16, 128  }
  0x2a   : > { %453 = vsyncadd (%p541_p8), %s129_s16, 4294967168  ;;  %v153_v0 = vld [vmem:[%s132_s17] sm:$0xff]  ;;  %vm159_vm0 = vcmask 1043456   ;;  %s150_s18 = scalar_lea.vmem [#allocation5], %s295_s15  ;;  %s303_s23 = sshll.u32 %s472_s9, 7 }
  0x2b   : > { %366 = vtanh.f32 %v153_v0  ;;  %s203_s22 = sshll.u32 %s150_s18, 4  ;;  %s201_s26 = scalar_lea.hbm %s633_s1, %s303_s23  ;;  %s204_s22 = int_to_ptr.vmem [resolvable:$true] %s203_s22 }
  0x2c   : > { %s187_s27 = scalar_lea.sflag [#allocation4], %s580_s13  ;;  %s400_s28 = scalar_lea.vmem %s204_s22, 128 }
  0x2d   : > { %p401_p8 = scmp.ne.s32.totalorder %s204_s22, %s400_s28  ;;  %s483_s29 = smov [#allocation5]  }
  0x2e   : > { %s404_s30 = sshll.u32 %s483_s29, 4  ;;  %s405_s30 = int_to_ptr.vmem [resolvable:$false] %s404_s30 }
  0x2f   : > { %p402_p11 = pnand %p401_p8, %p545_p9  ;;  %s406_s2 = scalar_lea.vmem %s405_s30, 256 }
  0x30   : > { %p407_p0 = scmp.lt.s32.totalorder %s204_s22, %s405_s30  ;;  %p408_p1 = scmp.lt.s32.totalorder %s406_s2, %s400_s28 }
  0x31   : > { %p403_p12 = pneg %p402_p11 }
  0x32   : > { %p409_p2 = por %p408_p1, %p407_p0 }
  0x34   : > { %p410_p3 = pnand %p409_p2, %p403_p12 }
  0x38   : > { %v367_v1 = vpop.eup %366 }
  0x39   : > { %v155_v2 = vmul.f32 %v367_v1, %v367_v1 }
  0x3b   : > { %v157_v3 = vcombine.high %v155_v2, %v155_v2  ;;  %v160_v4 = vsel %vm159_vm0, %v155_v2, 0.0 }
  0x3c   : > { %v161_v5 = vrot.slane %v160_v4, 4 }
  0x3d   : > { %v167_v6 = vsel %vm159_vm0, %v157_v3, 0.0 }
  0x3e   : > { %v162_v7 = vadd.f32 %v161_v5, %v160_v4  ;;  %v168_v8 = vrot.slane %v167_v6, 4 }
  0x40   : > { %v163_v9 = vrot.slane %v162_v7, 2  ;;  %v169_v10 = vadd.f32 %v168_v8, %v167_v6 }
  0x42   : > { %v164_v11 = vadd.f32 %v163_v9, %v162_v7  ;;  %v170_v12 = vrot.slane %v169_v10, 2 }
  0x44   : > { %v165_v13 = vrot.slane %v164_v11, 1  ;;  %v171_v14 = vadd.f32 %v170_v12, %v169_v10 }
  0x46   : > { %v166_v15 = vadd.f32 %v165_v13, %v164_v11  ;;  %v172_v16 = vrot.slane %v171_v14, 1 }
  0x48   : > { %v173_v17 = vadd.f32 %v172_v16, %v171_v14  ;;  %368 = vrsqrt.f32 %v166_v15  ;;  %vm174_vm1 = vcmp.gt.f32.partialorder %v166_v15, 0.0 }
  0x4a   : > { %370 = vrsqrt.f32 %v173_v17  ;;  %vm175_vm2 = vcmp.gt.f32.partialorder %v173_v17, 0.0 }
  0x55   : > { %v369_v18 = vpop.eup %368 }
  0x56   : > { %v178_v19 = vsel %vm174_vm1, %v369_v18, 1.0 }
  0x57   : > { %v371_v20 = vpop.eup %370 }
  0x58   : > { %v179_v21 = vsel %vm175_vm2, %v371_v20, 1.0 }
  0x59   : > { %v182_v22 = vcombine.low %v178_v19, %v179_v21 }
  0x5b   : > { %v184_v23 = vmul.f32 %v367_v1, %v182_v22 }
  0x5d   : > { %185 = vst [vmem:[%s150_s18] sm:$0xff] %v184_v23 }
  0x5e   : > { %413 = shalt.err (!%p410_p3)
}
  0x5f   : > { %s414_s9 = scalar_lea.hbm %s201_s26, 128  ;;  %s418_s5 = scalar_lea.hbm %s633_s1, 256 }
  0x60   : > { %p415_p5 = scmp.ne.s32.totalorder %s201_s26, %s414_s9  ;;  %p419_p10 = scmp.lt.s32.totalorder %s201_s26, %s633_s1 }
  0x61   : > { %p420_p4 = scmp.lt.s32.totalorder %s418_s5, %s414_s9 }
  0x62   : > { %p416_p6 = pnand %p415_p5, %p545_p9 }
  0x63   : > { %p421_p13 = por %p420_p4, %p419_p10 }
  0x64   : > { %p417_p7 = pneg %p416_p6 }
  0x66   : > { %p422_p8 = pnand %p421_p13, %p417_p7 }
  0x68   : > { %425 = shalt.err (!%p422_p8)
}
  0x69   : > { %306 = dma.vmem_to_hbm [thread:$0]  (%p545_p9), %s204_s22, 128, %s201_s26, %s187_s27  }
  0x6a PF: > { %s215_s15 = sand.u32 1, %s460_s6   ;;  %p639_p11 = scmp.ne.s32.totalorder %s637_s21, 0 }
  0x6b   : > { %p640_p12 = scmp.ge.s32.totalorder %s480_s11, 2  ;;  %s216_s16 = scalar_lea.sflag [#allocation4], %s215_s15 }
  0x6d   : > { %p313_p0 = pnand %p640_p12, %p639_p11 }
  0x6f   : > { %p314_p1 = pneg %p313_p0 }
  0x71   : > { %455 = dma.done.wait (%p314_p1), %s216_s16, 128  }
  0x72   : > { %457 = vsyncadd (%p314_p1), %s216_s16, 4294967168  ;;  %s17_s11 = sadd.s32 1, %s480_s11   ;;  %s641_s6 = smov %s464_s7 }
  0x73   : > { %p14_p2 = scmp.ge.s32.totalorder %s17_s11, 4   ;;  %s642_s7 = smov %s468_s8 }
  0x74   : > { %s643_s8 = smov %s550_s20  ;;  %s644_s9 = smov %s476_s10 }
  0x75   : > { %s645_s10 = smov %s647_s14  ;;  %16 = sbr.rel (!%p14_p2) target bundleno = 6 (0x6), region = 69 }
  0x7a   :  { %221 = vsyncpa [#allocation3], 1 }
  0x7b   :  { %223 = vsyncpa [#allocation3 + $0x1], 1 }
  0x7c   :  { %224 = vsyncpa [#allocation4], 1 }
  0x7d   :  { %226 = vsyncpa [#allocation4 + $0x1], 1 }

</bundles_post_ra>
